<compile_context>
chip_gen: v5e
topology: v5e:2x2
jax: 0.10.0
libtpu: 0.0.40
codegen_flags: <defaults>
</compile_context>

<pallas_src>
import jax
import jax.numpy as jnp
from jax.experimental import pallas as pl
from jax.experimental.pallas import tpu as pltpu

IN_DIM = 8        # lunar-lander observation size
HID = 64          # hidden_count
OUT_DIM = 4       # number of actions

HID_PAD = 128     # hidden width padded to one lane-width
MAX_BLOCK_B = 2048  # upper bound on the batch tile (VMEM stays < ~5 MiB/block)


def _cdiv(a, b):
    return -(-a // b)


def _round_up(n, m):
    return _cdiv(n, m) * m


def _choose_blocking(batch):
    """Pick (block_b, n_blocks): minimal padding, and for B >= 16 an even
    number (>= 2) of blocks so v7x's two TensorCores both get work."""
    if batch < 16:
        return _round_up(max(batch, 1), 8), 1
    n_blocks = max(2, _cdiv(batch, MAX_BLOCK_B))
    if n_blocks % 2:
        n_blocks += 1
    # Granularity 8 keeps padding minimal; rounding block_b to 256 would fill
    # whole MXU passes on v6e/v7x but the kernel is overhead/writeback bound,
    # so minimal padding is the better trade here.
    block_b = _round_up(_cdiv(batch, n_blocks), 8)
    return block_b, n_blocks


def dqn_mlp_kernel(x_ref, w1_ref, w23_ref, b_ref, o_ref):
    # Static slices of the packed parameter slabs (zero-cost views; offsets
    # 0 / 128 are multiples of the bf16 (16, 128) tile).
    w1 = w1_ref[...]                                 # (8, 128)   bf16
    w2 = w23_ref[0:HID_PAD, :]                       # (128, 128) bf16
    w3 = w23_ref[HID_PAD:2 * HID_PAD, :]             # (128, 128) bf16
    b1 = b_ref[0:1, :]                               # (1, 128)   f32
    b2 = b_ref[1:2, :]
    b3 = b_ref[2:3, :]

    # Activations arrive unpadded in f32; bf16 cast happens here on the VPU
    # (co-issues with MXU work). Padded batch rows are zeros from jnp.pad.
    x = x_ref[...].astype(jnp.bfloat16)              # (block_b, 8) bf16

    # Layer 1: Linear + ReLU  (bf16 MXU, f32 accumulate)
    h1 = jnp.dot(x, w1, preferred_element_type=jnp.float32)
    h1 = jnp.maximum(h1 + b1, 0.0)

    # Layer 2: NoisyLinear (effective weights precomputed) + ReLU
    h2 = jnp.dot(h1.astype(jnp.bfloat16), w2, preferred_element_type=jnp.float32)
    h2 = jnp.maximum(h2 + b2, 0.0)

    # Layer 3: NoisyLinear (effective weights precomputed)
    out = jnp.dot(h2.astype(jnp.bfloat16), w3, preferred_element_type=jnp.float32)
    out = out + b3                                   # (block_b, 128) f32

    # Native 4-column store: 32x less HBM writeback than a (B, 128) f32 slab;
    # no reductions ever touch the padded batch rows.
    o_ref[...] = out[:, :OUT_DIM].astype(o_ref.dtype)


def dqn_forward(x, w1_slab, w23_slab, b_slab, out_dim=OUT_DIM):
    """x: (B, in_dim) f32 -> (B, out_dim) f32 Q-values."""
    batch, in_dim = x.shape
    assert in_dim == IN_DIM
    x = x.astype(jnp.float32)

    block_b, n_blocks = _choose_blocking(batch)
    b_pad = block_b * n_blocks
    if b_pad != batch:
        x = jnp.pad(x, ((0, b_pad - batch), (0, 0)))     # batch-row padding only

    flops = 2 * b_pad * (IN_DIM * HID_PAD + 2 * HID_PAD * HID_PAD)
    bytes_accessed = (b_pad * IN_DIM * 4 + b_pad * OUT_DIM * 4
                      + IN_DIM * HID_PAD * 2 + 2 * HID_PAD * HID_PAD * 2
                      + 8 * HID_PAD * 4)

    out = pl.pallas_call(
        dqn_mlp_kernel,
        out_shape=jax.ShapeDtypeStruct((b_pad, OUT_DIM), jnp.float32),
        grid=(n_blocks,),
        in_specs=[
            pl.BlockSpec((block_b, IN_DIM), lambda i: (i, 0)),        # activations
            pl.BlockSpec((IN_DIM, HID_PAD), lambda i: (0, 0)),        # W1
            pl.BlockSpec((2 * HID_PAD, HID_PAD), lambda i: (0, 0)),   # W2 | W3 slab
            pl.BlockSpec((8, HID_PAD), lambda i: (0, 0)),             # bias slab
        ],
        out_specs=pl.BlockSpec((block_b, OUT_DIM), lambda i: (i, 0)),
        compiler_params=pltpu.CompilerParams(
            dimension_semantics=("parallel",),    # v7x: 2 TCs split batch blocks
        ),
        cost_estimate=pl.CostEstimate(flops=flops, transcendentals=0,
                                      bytes_accessed=bytes_accessed),
    )(x, w1_slab, w23_slab, b_slab)

    return out[:batch, :out_dim]


# ----------------------------------------------------------------------------
# Parameter construction (mirrors the PyTorch module's init)
# ----------------------------------------------------------------------------

def xavier_uniform(key, shape):
    fan_in, fan_out = shape
    limit = jnp.sqrt(6.0 / (fan_in + fan_out))
    return jax.random.uniform(key, shape, jnp.float32, -limit, limit)


def make_params(key, in_dim=IN_DIM, hidden=HID, out_dim=OUT_DIM):
    ks = jax.random.split(key, 10)

    # Layer 0: plain Linear (xavier_uniform weight, PyTorch-default uniform bias).
    w1 = xavier_uniform(ks[0], (in_dim, hidden))
    b1 = jax.random.uniform(ks[1], (hidden,), jnp.float32,
                            -1.0 / jnp.sqrt(in_dim), 1.0 / jnp.sqrt(in_dim))

    # Layers 2 & 4: NoisyLinear — effective weight = w_mu + sigma * eps.
    # TODO(synk): per-forward factorized noise resampling (training-time
    # NoisyLinear behaviour) is done outside the kernel by rebuilding these
    # slabs; the kernel itself is unchanged.
    sigma0 = 0.017

    def noisy(kw, kb, kew, keb, shape):
        w_mu = xavier_uniform(kw, shape)
        b_mu = jax.random.uniform(kb, (shape[1],), jnp.float32,
                                  -1.0 / jnp.sqrt(shape[0]),
                                  1.0 / jnp.sqrt(shape[0]))
        w_eps = jax.random.normal(kew, shape, jnp.float32)
        b_eps = jax.random.normal(keb, (shape[1],), jnp.float32)
        return w_mu + sigma0 * w_eps, b_mu + sigma0 * b_eps

    w2, b2 = noisy(ks[2], ks[3], ks[4], ks[5], (hidden, hidden))
    w3, b3 = noisy(ks[6], ks[7], ks[8], ks[9], (hidden, out_dim))

    # Pack into the kernel's resident slabs.
    w1_slab = jnp.zeros((in_dim, HID_PAD), jnp.float32)
    w1_slab = w1_slab.at[:, :hidden].set(w1).astype(jnp.bfloat16)

    w23_slab = jnp.zeros((2 * HID_PAD, HID_PAD), jnp.float32)
    w23_slab = w23_slab.at[:hidden, :hidden].set(w2)
    w23_slab = w23_slab.at[HID_PAD:HID_PAD + hidden, :out_dim].set(w3)
    w23_slab = w23_slab.astype(jnp.bfloat16)

    b_slab = jnp.zeros((8, HID_PAD), jnp.float32)
    b_slab = b_slab.at[0, :hidden].set(b1)
    b_slab = b_slab.at[1, :hidden].set(b2)
    b_slab = b_slab.at[2, :out_dim].set(b3)

    return w1_slab, w23_slab, b_slab, (w1, b1, w2, b2, w3, b3)


def reference(x, w1, b1, w2, b2, w3, b3):
    # Mirrors the kernel's numerics: bf16 weights/activations, f32 accumulate.
    def mm(a, w):
        return jnp.dot(a.astype(jnp.bfloat16), w.astype(jnp.bfloat16),
                       preferred_element_type=jnp.float32)
    h1 = jnp.maximum(mm(x, w1) + b1, 0.0)
    h2 = jnp.maximum(mm(h1, w2) + b2, 0.0)
    return mm(h2, w3) + b3


if __name__ == "__main__":
    key = jax.random.PRNGKey(0)
    kx, kx2, kp = jax.random.split(key, 3)

    w1_slab, w23_slab, b_slab, raw = make_params(kp)

    fwd = jax.jit(lambda xs: dqn_forward(xs, w1_slab, w23_slab, b_slab))

    # Small batch (B=2): single 8-row block through the padded path.
    x_small = jax.random.normal(kx, (2, IN_DIM), jnp.float32)
    y_small = jax.block_until_ready(fwd(x_small))
    assert y_small.shape == (2, OUT_DIM)
    assert jnp.allclose(y_small, reference(x_small, *raw), atol=1e-4, rtol=1e-4), \
        "small-batch mismatch vs reference"

    # Batched evaluation (B=128): two 64-row blocks, no padding waste,
    # both v7x TensorCores active.
    x_big = jax.random.normal(kx2, (128, IN_DIM), jnp.float32)
    y_big = jax.block_until_ready(fwd(x_big))
    assert y_big.shape == (128, OUT_DIM)
    assert jnp.allclose(y_big, reference(x_big, *raw), atol=1e-4, rtol=1e-4), \
        "batched mismatch vs reference"

    print("KERNEL_OK")
</pallas_src>

<mosaic_0001>
module attributes {stable_mosaic.version = 11 : i64} {
  func.func @dqn_mlp_kernel(%arg0: i32, %arg1: memref<8x8xf32, #tpu.memory_space<vmem>>, %arg2: memref<8x128xbf16, #tpu.memory_space<vmem>>, %arg3: memref<256x128xbf16, #tpu.memory_space<vmem>>, %arg4: memref<8x128xf32, #tpu.memory_space<vmem>>, %arg5: memref<8x4xf32, #tpu.memory_space<vmem>>) attributes {dimension_semantics = [#tpu.dimension_semantics<parallel>], iteration_bounds = array<i64: 1>, scalar_prefetch = 0 : i64, scratch_operands = 0 : i64, tpu.core_type = #tpu.core_type<tc>, window_params = [{transform_indices = @transform_0, window_bounds = array<i64: 8, 8>}, {pipeline_mode = #tpu.pipeline_mode<synchronous>, transform_indices = @transform_1, window_bounds = array<i64: 8, 128>}, {pipeline_mode = #tpu.pipeline_mode<synchronous>, transform_indices = @transform_2, window_bounds = array<i64: 256, 128>}, {pipeline_mode = #tpu.pipeline_mode<synchronous>, transform_indices = @transform_3, window_bounds = array<i64: 8, 128>}, {transform_indices = @transform_4, window_bounds = array<i64: 8, 4>}]} {
    %c0 = arith.constant 0 : index
    %c0_0 = arith.constant 0 : index
    %0 = vector.load %arg2[%c0, %c0_0] : memref<8x128xbf16, #tpu.memory_space<vmem>>, vector<8x128xbf16>
    %c0_1 = arith.constant 0 : index
    %c0_2 = arith.constant 0 : index
    %1 = vector.load %arg3[%c0_1, %c0_2] : memref<256x128xbf16, #tpu.memory_space<vmem>>, vector<128x128xbf16>
    %c128 = arith.constant 128 : index
    %c0_3 = arith.constant 0 : index
    %2 = vector.load %arg3[%c128, %c0_3] : memref<256x128xbf16, #tpu.memory_space<vmem>>, vector<128x128xbf16>
    %c0_4 = arith.constant 0 : index
    %c0_5 = arith.constant 0 : index
    %3 = vector.load %arg4[%c0_4, %c0_5] : memref<8x128xf32, #tpu.memory_space<vmem>>, vector<1x128xf32>
    %c1 = arith.constant 1 : index
    %c0_6 = arith.constant 0 : index
    %4 = vector.load %arg4[%c1, %c0_6] : memref<8x128xf32, #tpu.memory_space<vmem>>, vector<1x128xf32>
    %c2 = arith.constant 2 : index
    %c0_7 = arith.constant 0 : index
    %5 = vector.load %arg4[%c2, %c0_7] : memref<8x128xf32, #tpu.memory_space<vmem>>, vector<1x128xf32>
    %c0_8 = arith.constant 0 : index
    %c0_9 = arith.constant 0 : index
    %6 = vector.load %arg1[%c0_8, %c0_9] : memref<8x8xf32, #tpu.memory_space<vmem>>, vector<8x8xf32>
    %7 = arith.truncf %6 : vector<8x8xf32> to vector<8x8xbf16>
    %cst = arith.constant dense<0.000000e+00> : vector<8x128xf32>
    %8 = tpu.matmul %7, %0, %cst {dimension_numbers = #tpu.dot_dimension_numbers<[1], [0], [0], [1], [0, 0, 1, 1], [], []>} : vector<8x8xbf16>, vector<8x128xbf16>, vector<8x128xf32> -> vector<8x128xf32>
    %9 = vector.broadcast %3 : vector<1x128xf32> to vector<8x128xf32>
    %10 = arith.addf %8, %9 : vector<8x128xf32>
    %cst_10 = arith.constant 0.000000e+00 : f32
    %11 = vector.broadcast %cst_10 : f32 to vector<8x128xf32>
    %12 = arith.maximumf %10, %11 : vector<8x128xf32>
    %13 = arith.truncf %12 : vector<8x128xf32> to vector<8x128xbf16>
    %cst_11 = arith.constant dense<0.000000e+00> : vector<8x128xf32>
    %14 = tpu.matmul %13, %1, %cst_11 {dimension_numbers = #tpu.dot_dimension_numbers<[1], [0], [0], [1], [0, 0, 1, 1], [], []>} : vector<8x128xbf16>, vector<128x128xbf16>, vector<8x128xf32> -> vector<8x128xf32>
    %15 = vector.broadcast %4 : vector<1x128xf32> to vector<8x128xf32>
    %16 = arith.addf %14, %15 : vector<8x128xf32>
    %cst_12 = arith.constant 0.000000e+00 : f32
    %17 = vector.broadcast %cst_12 : f32 to vector<8x128xf32>
    %18 = arith.maximumf %16, %17 : vector<8x128xf32>
    %19 = arith.truncf %18 : vector<8x128xf32> to vector<8x128xbf16>
    %cst_13 = arith.constant dense<0.000000e+00> : vector<8x128xf32>
    %20 = tpu.matmul %19, %2, %cst_13 {dimension_numbers = #tpu.dot_dimension_numbers<[1], [0], [0], [1], [0, 0, 1, 1], [], []>} : vector<8x128xbf16>, vector<128x128xbf16>, vector<8x128xf32> -> vector<8x128xf32>
    %21 = vector.broadcast %5 : vector<1x128xf32> to vector<8x128xf32>
    %22 = arith.addf %20, %21 : vector<8x128xf32>
    %23 = vector.extract_strided_slice %22 {offsets = [0, 0], sizes = [8, 4], strides = [1, 1]} : vector<8x128xf32> to vector<8x4xf32>
    %c0_14 = arith.constant 0 : index
    %c0_15 = arith.constant 0 : index
    %24 = vector.load %arg5[%c0_14, %c0_15] : memref<8x4xf32, #tpu.memory_space<vmem>>, vector<8x4xf32>
    tpu.vector_store %arg5[%c0_14, %c0_15], %23 {strides = array<i32>} : memref<8x4xf32, #tpu.memory_space<vmem>>, vector<8x4xf32>,
    return
  }
  func.func @transform_0(%arg0: i32) -> (i32, i32) {
    %c0_i32 = arith.constant 0 : i32
    %c0_i32_0 = arith.constant 0 : i32
    return %arg0, %c0_i32 : i32, i32
  }
  func.func @transform_1(%arg0: i32) -> (i32, i32) {
    %c0_i32 = arith.constant 0 : i32
    %c0_i32_0 = arith.constant 0 : i32
    %c0_i32_1 = arith.constant 0 : i32
    return %c0_i32, %c0_i32_0 : i32, i32
  }
  func.func @transform_2(%arg0: i32) -> (i32, i32) {
    %c0_i32 = arith.constant 0 : i32
    %c0_i32_0 = arith.constant 0 : i32
    %c0_i32_1 = arith.constant 0 : i32
    return %c0_i32, %c0_i32_0 : i32, i32
  }
  func.func @transform_3(%arg0: i32) -> (i32, i32) {
    %c0_i32 = arith.constant 0 : i32
    %c0_i32_0 = arith.constant 0 : i32
    %c0_i32_1 = arith.constant 0 : i32
    return %c0_i32, %c0_i32_0 : i32, i32
  }
  func.func @transform_4(%arg0: i32) -> (i32, i32) {
    %c0_i32 = arith.constant 0 : i32
    %c0_i32_0 = arith.constant 0 : i32
    return %arg0, %c0_i32 : i32, i32
  }
}

</mosaic_0001>

<bundles_post_ra>
// kernel: _lambda_.1
= control target key start
LH: loop header
LB: loop body
LE: loop exit
PB: predicated region body
PF: predicated region fallthrough
CT: control target
= control target key end

     0   :  { %9 = vsyncpa [#allocation3], 0  ;;  %s342_s18 = smov [#allocation2]   ;;  %s343_s20 = smov 64   ;;  %s391_s0 = inlined_call_operand.vmem [shape: f32[8,8], index: 0, kind: input, shape index: {}]   ;;  %s392_s1 = inlined_call_operand.vmem [shape: bf16[8,128], index: 1, kind: input, shape index: {}]   ;;  %s393_s2 = inlined_call_operand.hbm [shape: bf16[256,128], index: 2, kind: input, shape index: {}]   ;;  %s394_s3 = inlined_call_operand.vmem [shape: f32[8,128], index: 3, kind: input, shape index: {}]   ;;  %s395_s4 = inlined_call_operand.vmem [shape: f32[8,4], index: 4, kind: output, shape index: {}]  }
   0x1   :  { %s18_s17 = sshll.u32 %s393_s2, 4  ;;  %s20_s19 = sshll.u32 %s342_s18, 4  ;;  %s19_s17 = int_to_ptr.hbm [resolvable:$true] %s18_s17  ;;  %s21_s19 = int_to_ptr.vmem [resolvable:$true] %s20_s19 }
   0x2   :  { %s344_s21 = smov 4  }
   0x3   :  { %26 = dma.hbm_to_vmem [thread:$0]  %s19_s17, 2048, %s21_s19, [#allocation3], %s343_s20, %s343_s20, %s344_s21  }
   0x4   :  { %340 = dma.done.wait [#allocation3], 2048  }
   0x5   :  { %341 = vsyncadd [#allocation3], 4294965248  ;;  %vm77_vm0 = vcmask 1043456   ;;  %v34_v0 = vld [vmem:[%s392_s1] sm:$0xf]  ;;  %v301_v2 = vld [vmem:[#allocation2 + $0x38] sm:$0xff] }
   0x6   :  { %v70_v1 = vld [vmem:[%s391_s0] sm:$0xff]  ;;  %v79_v3 = vsel %vm77_vm0, %v34_v0, 0  ;;  %vm73_vm1 = vcmask 64512   ;;  %145 = vmatpush.bf16.msra.mxu1 %v301_v2  ;;  %v300_v5 = vld [vmem:[#allocation2 + $0x30] sm:$0xff]  ;;  %v299_v6 = vld [vmem:[#allocation2 + $0x28] sm:$0xff]  ;;  %vm222_vm2 = vcmask 31744  }
   0x7   :  { %v71_v4 = vpack.c.bf16 %v70_v1, %v70_v1  ;;  %88 = vmatpush.bf16.msra.mxu0 %v79_v3  ;;  %v298_v7 = vld [vmem:[#allocation2 + $0x20] sm:$0xff]  ;;  %v297_v8 = vld [vmem:[#allocation2 + $0x18] sm:$0xff]  ;;  %v296_v9 = vld [vmem:[#allocation2 + $0x10] sm:$0xff] }
   0x8   :  { %v295_v10 = vld [vmem:[#allocation2 + $0x8] sm:$0xff]  ;;  %v294_v11 = vld [vmem:[#allocation2] sm:$0xff]  ;;  %v309_v12 = vld [vmem:[#allocation2 + $0x78] sm:$0xff] }
   0x9   :  { %209 = vmatpush.bf16.msra.mxu2 %v309_v12  ;;  %v308_v13 = vld [vmem:[#allocation2 + $0x70] sm:$0xff]  ;;  %v307_v14 = vld [vmem:[#allocation2 + $0x68] sm:$0xff]  ;;  %v306_v15 = vld [vmem:[#allocation2 + $0x60] sm:$0xff] }
   0xa   :  { %229 = vmatmul.msk.bf16.vlgmr.msra.gmra.mxu0 %vm73_vm1, %v71_v4  ;;  %146 = vmatpush.bf16.msra.mxu1 %v300_v5  ;;  %v305_v16 = vld [vmem:[#allocation2 + $0x58] sm:$0xff]  ;;  %v304_v17 = vld [vmem:[#allocation2 + $0x50] sm:$0xff]  ;;  %v313_v18 = vld [vmem:[%s394_s3] ss:$0 sm:$0xff] }
   0xb   :  { %v303_v24 = vld [vmem:[#allocation2 + $0x48] sm:$0xff]  ;;  %v302_v25 = vld [vmem:[#allocation2 + $0x40] sm:$0xff] }
   0xc   :  { %v314_v26 = vld [vmem:[%s394_s3 + $0x1] ss:$0 sm:$0xff]  ;;  %v315_v32 = vld [vmem:[%s394_s3 + $0x2] ss:$0 sm:$0xff] }
   0xd   :  { %210 = vmatpush.bf16.msra.mxu2 %v308_v13 }
   0xe   :  { %147 = vmatpush.bf16.msra.mxu1 %v299_v6 }
  0x11   :  { %211 = vmatpush.bf16.msra.mxu2 %v307_v14 }
  0x12   :  { %148 = vmatpush.bf16.msra.mxu1 %v298_v7 }
  0x15   :  { %212 = vmatpush.bf16.msra.mxu2 %v306_v15 }
  0x16   :  { %149 = vmatpush.bf16.msra.mxu1 %v297_v8 }
  0x19   :  { %213 = vmatpush.bf16.msra.mxu2 %v305_v16 }
  0x1a   :  { %150 = vmatpush.bf16.msra.mxu1 %v296_v9 }
  0x1d   :  { %214 = vmatpush.bf16.msra.mxu2 %v304_v17 }
  0x1e   :  { %151 = vmatpush.bf16.msra.mxu1 %v295_v10 }
  0x21   :  { %215 = vmatpush.bf16.msra.mxu2 %v303_v24 }
  0x22   :  { %152 = vmatpush.bf16.msra.mxu1 %v294_v11 }
  0x25   :  { %216 = vmatpush.bf16.msra.mxu2 %v302_v25 }
  0x87   :  { %v90_v19 = vpop.f32.mrf.mxu0 }
  0x88   :  { %v91_v20 = vadd.f32 %v313_v18, %v90_v19 }
  0x8a   :  { %v94_v21 = vmax.f32 %v91_v20, 0.0 }
  0x8c   :  { %v95_v22 = vpack.c.bf16 %v94_v21, %v94_v21 }
  0x8e   :  { %153 = vmatmul.bf16.vlgmr.msra.gmra.mxu1 %v95_v22 }
  0x8f   :  { %v92_v23 = vpop.f32.mrf.mxu0 }
 0x10b   :  { %v154_v27 = vpop.f32.mrf.mxu1 }
 0x10c   :  { %v155_v28 = vadd.f32 %v314_v26, %v154_v27 }
 0x10e   :  { %v158_v29 = vmax.f32 %v155_v28, 0.0 }
 0x110   :  { %v159_v30 = vpack.c.bf16 %v158_v29, %v158_v29 }
 0x112   :  { %217 = vmatmul.bf16.vlgmr.msra.gmra.mxu2 %v159_v30 }
 0x113   :  { %v156_v31 = vpop.f32.mrf.mxu1 }
 0x195   :  { %v218_v33 = vpop.f32.mrf.mxu2 }
 0x196   :  { %v219_v34 = vadd.f32 %v315_v32, %v218_v33 }
 0x198   :  { %223 = vst.msk [vmem:[%s395_s4] sm:$0xff] %vm222_vm2, %v219_v34 }
 0x19d   :  { %v220_v35 = vpop.f32.mrf.mxu2 }
 0x19e   :  { %228 = vsyncpa [#allocation3], 1 }

</bundles_post_ra>
